<compile_context>
chip_gen: v6e
topology: v6e:2x2x1
jax: 0.10.0
libtpu: 0.0.40
codegen_flags: <defaults>
</compile_context>

<pallas_src>
import jax
import jax.numpy as jnp
from jax.experimental import pallas as pl
from jax.experimental.pallas import tpu as pltpu

HID = 250          # logical hidden width (matches PyTorch)
HID_PAD = 256      # 250 -> 256 (128-lane aligned)
OUT_PAD = 128      # action_dim -> 128 (lane-dense output tile)


def _round_up(x, m):
    return ((x + m - 1) // m) * m


def make_actor_kernel(action_limit_v, action_limit_w):
    v_lim = float(action_limit_v)
    w_lim = float(action_limit_w)

    def actor_kernel(s_ref, w1_ref, b1_ref, w2_ref, b2_ref, w3_ref, b3_ref,
                     out_ref):
        # fa1 -> relu : [TB, S](bf16) @ [S, 256](bf16) -> f32 acc
        x = jnp.dot(s_ref[...], w1_ref[...], preferred_element_type=jnp.float32)
        x = jnp.maximum(x + b1_ref[...], 0.0)
        # fa2 -> relu : [TB, 256] @ [256, 256]  (bf16 operands, f32 acc)
        x = jnp.dot(x.astype(jnp.bfloat16), w2_ref[...],
                    preferred_element_type=jnp.float32)
        x = jnp.maximum(x + b2_ref[...], 0.0)
        # fa3 : [TB, 256] @ [256, 128]  (lane-dense padded output head)
        a = jnp.dot(x.astype(jnp.bfloat16), w3_ref[...],
                    preferred_element_type=jnp.float32) + b3_ref[...]

        # Per-column squash (f32, single transcendental pass):
        #   col 0: sigmoid(a) * v_lim
        #   col 1: tanh(a)    * w_lim  == (2*sigmoid(2a) - 1) * w_lim
        #   cols >= 2: passthrough (matches the PyTorch code).
        col = jax.lax.broadcasted_iota(jnp.int32, a.shape, 1)
        u = jnp.where(col == 0, a, 2.0 * a)
        s = pl.reciprocal(1.0 + jnp.exp(-u), approx=True)     # sigmoid(u)
        out = jnp.where(col == 0, s * v_lim,
                        jnp.where(col == 1, (2.0 * s - 1.0) * w_lim, a))
        out_ref[...] = out

    return actor_kernel


def _pick_tb(B):
    """Batch tile: multiple of 16 (bf16 sublane tile); >=2 grid steps once
    B >= 16 so v7x megacore sharding engages; capped at 512 to amortize the
    per-grid-step overhead while keeping the VMEM footprint tiny."""
    if B < 16:
        return _round_up(max(B, 1), 16)
    half = -(-B // 2)                       # cdiv(B, 2)
    return min(512, _round_up(half, 16))


def actor_forward(state, padded_params, action_limit_v, action_limit_w,
                  action_dim):
    """state: [B, state_dim] (or [state_dim]); returns [B, action_dim] f32."""
    w1, b1, w2, b2, w3, b3 = padded_params

    squeeze = (state.ndim == 1)
    if squeeze:
        state = state[None, :]
    B, S = state.shape

    TB = _pick_tb(B)
    B_pad = _round_up(B, TB)
    state = state.astype(jnp.bfloat16)
    if B_pad != B:
        state = jnp.pad(state, ((0, B_pad - B), (0, 0)))

    resident = lambda shape: pl.BlockSpec(shape, lambda i: (0, 0))

    out = pl.pallas_call(
        make_actor_kernel(action_limit_v, action_limit_w),
        out_shape=jax.ShapeDtypeStruct((B_pad, OUT_PAD), jnp.float32),
        grid=(B_pad // TB,),
        in_specs=[
            pl.BlockSpec((TB, S), lambda i: (i, 0)),      # state, tiled on batch
            resident(w1.shape), resident(b1.shape),       # weights/biases stay put
            resident(w2.shape), resident(b2.shape),
            resident(w3.shape), resident(b3.shape),
        ],
        out_specs=pl.BlockSpec((TB, OUT_PAD), lambda i: (i, 0)),
        compiler_params=pltpu.CompilerParams(
            dimension_semantics=("parallel",),   # megacore sharding on v7x
            vmem_limit_bytes=16 << 20,           # actual footprint is a few MiB
        ),
    )(state, w1, b1, w2, b2, w3, b3)

    out = out[:B, :action_dim]
    if squeeze:
        out = out[0]
    return out


def xavier_uniform(key, fan_in, fan_out):
    # torch.nn.init.xavier_uniform_ on a (fan_out, fan_in) weight; generated
    # directly in the transposed [in, out] layout used by the kernel.
    bound = (6.0 / (fan_in + fan_out)) ** 0.5
    return jax.random.uniform(key, (fan_in, fan_out), jnp.float32, -bound, bound)


def init_params(key, state_dim, action_dim):
    """Logical (unpadded, f32) params, mirroring the PyTorch initialization."""
    k1, k2, k3 = jax.random.split(key, 3)
    w1 = xavier_uniform(k1, state_dim, HID)            # fa1: [state_dim, 250]
    b1 = jnp.full((HID,), 0.01, jnp.float32)
    w2 = xavier_uniform(k2, HID, HID)                  # fa2: [250, 250]
    b2 = jnp.full((HID,), 0.01, jnp.float32)
    w3 = xavier_uniform(k3, HID, action_dim)           # fa3: [250, action_dim]
    b3 = jnp.full((action_dim,), 0.01, jnp.float32)
    return (w1, b1, w2, b2, w3, b3)


def pad_params(logical):
    """Zero-pad to MXU/lane-aligned shapes and cast weights to bf16 (biases
    stay f32; the bias-add / ReLU / squash run in f32 with f32 MXU
    accumulation).  Padded bias lanes are 0.0 and the corresponding weight
    rows/cols are 0.0, so padded hidden units are exactly 0 after ReLU and
    contribute nothing downstream — the math is unchanged."""
    w1, b1, w2, b2, w3, b3 = logical
    S = w1.shape[0]
    A = w3.shape[1]
    w1p = jnp.zeros((S, HID_PAD), jnp.float32).at[:, :HID].set(w1)
    b1p = jnp.zeros((1, HID_PAD), jnp.float32).at[0, :HID].set(b1)
    w2p = jnp.zeros((HID_PAD, HID_PAD), jnp.float32).at[:HID, :HID].set(w2)
    b2p = jnp.zeros((1, HID_PAD), jnp.float32).at[0, :HID].set(b2)
    w3p = jnp.zeros((HID_PAD, OUT_PAD), jnp.float32).at[:HID, :A].set(w3)
    b3p = jnp.zeros((1, OUT_PAD), jnp.float32).at[0, :A].set(b3)
    return (w1p.astype(jnp.bfloat16), b1p,
            w2p.astype(jnp.bfloat16), b2p,
            w3p.astype(jnp.bfloat16), b3p)


def reference_forward(state, logical, action_limit_v, action_limit_w):
    w1, b1, w2, b2, w3, b3 = logical
    x = jax.nn.relu(state @ w1 + b1)
    x = jax.nn.relu(x @ w2 + b2)
    a = x @ w3 + b3
    a0 = jax.nn.sigmoid(a[:, 0:1]) * action_limit_v
    a1 = jnp.tanh(a[:, 1:2]) * action_limit_w
    return jnp.concatenate([a0, a1, a[:, 2:]], axis=1)


if __name__ == "__main__":
    state_dim, action_dim, batch = 16, 2, 2
    action_limit_v, action_limit_w = 0.22, 2.0

    key = jax.random.PRNGKey(0)
    kp, ks = jax.random.split(key)

    logical = init_params(kp, state_dim, action_dim)
    padded = pad_params(logical)
    state = jax.random.normal(ks, (batch, state_dim), jnp.float32)

    out = actor_forward(state, padded, action_limit_v, action_limit_w,
                        action_dim)
    out = jax.block_until_ready(out)

    ref = reference_forward(state, logical, action_limit_v, action_limit_w)
    assert out.shape == (batch, action_dim)
    # bf16 matmul operands (f32 accumulation) -> loosen tolerance vs. f32 ref.
    assert jnp.allclose(out, ref, atol=2e-2, rtol=2e-2)

    print("KERNEL_OK")
</pallas_src>

<mosaic_0001>
module attributes {stable_mosaic.version = 11 : i64} {
  func.func @actor_kernel(%arg0: i32, %arg1: memref<16x16xbf16, #tpu.memory_space<vmem>>, %arg2: memref<16x256xbf16, #tpu.memory_space<vmem>>, %arg3: memref<1x256xf32, #tpu.memory_space<vmem>>, %arg4: memref<256x256xbf16, #tpu.memory_space<vmem>>, %arg5: memref<1x256xf32, #tpu.memory_space<vmem>>, %arg6: memref<256x128xbf16, #tpu.memory_space<vmem>>, %arg7: memref<1x128xf32, #tpu.memory_space<vmem>>, %arg8: memref<16x128xf32, #tpu.memory_space<vmem>>) attributes {dimension_semantics = [#tpu.dimension_semantics<parallel>], iteration_bounds = array<i64: 1>, scalar_prefetch = 0 : i64, scratch_operands = 0 : i64, tpu.core_type = #tpu.core_type<tc>, window_params = [{transform_indices = @transform_0, window_bounds = array<i64: 16, 16>}, {pipeline_mode = #tpu.pipeline_mode<synchronous>, transform_indices = @transform_1, window_bounds = array<i64: 16, 256>}, {pipeline_mode = #tpu.pipeline_mode<synchronous>, transform_indices = @transform_2, window_bounds = array<i64: 1, 256>}, {pipeline_mode = #tpu.pipeline_mode<synchronous>, transform_indices = @transform_3, window_bounds = array<i64: 256, 256>}, {pipeline_mode = #tpu.pipeline_mode<synchronous>, transform_indices = @transform_4, window_bounds = array<i64: 1, 256>}, {pipeline_mode = #tpu.pipeline_mode<synchronous>, transform_indices = @transform_5, window_bounds = array<i64: 256, 128>}, {pipeline_mode = #tpu.pipeline_mode<synchronous>, transform_indices = @transform_6, window_bounds = array<i64: 1, 128>}, {transform_indices = @transform_7, window_bounds = array<i64: 16, 128>}]} {
    %c0 = arith.constant 0 : index
    %c0_0 = arith.constant 0 : index
    %0 = vector.load %arg1[%c0, %c0_0] : memref<16x16xbf16, #tpu.memory_space<vmem>>, vector<16x16xbf16>
    %c0_1 = arith.constant 0 : index
    %c0_2 = arith.constant 0 : index
    %1 = vector.load %arg2[%c0_1, %c0_2] : memref<16x256xbf16, #tpu.memory_space<vmem>>, vector<16x256xbf16>
    %cst = arith.constant dense<0.000000e+00> : vector<16x256xf32>
    %2 = tpu.matmul %0, %1, %cst {dimension_numbers = #tpu.dot_dimension_numbers<[1], [0], [0], [1], [0, 0, 1, 1], [], []>} : vector<16x16xbf16>, vector<16x256xbf16>, vector<16x256xf32> -> vector<16x256xf32>
    %c0_3 = arith.constant 0 : index
    %c0_4 = arith.constant 0 : index
    %3 = vector.load %arg3[%c0_3, %c0_4] : memref<1x256xf32, #tpu.memory_space<vmem>>, vector<1x256xf32>
    %4 = vector.broadcast %3 : vector<1x256xf32> to vector<16x256xf32>
    %5 = arith.addf %2, %4 : vector<16x256xf32>
    %cst_5 = arith.constant 0.000000e+00 : f32
    %6 = vector.broadcast %cst_5 : f32 to vector<16x256xf32>
    %7 = arith.maximumf %5, %6 : vector<16x256xf32>
    %8 = arith.truncf %7 : vector<16x256xf32> to vector<16x256xbf16>
    %c0_6 = arith.constant 0 : index
    %c0_7 = arith.constant 0 : index
    %9 = vector.load %arg4[%c0_6, %c0_7] : memref<256x256xbf16, #tpu.memory_space<vmem>>, vector<256x256xbf16>
    %cst_8 = arith.constant dense<0.000000e+00> : vector<16x256xf32>
    %10 = tpu.matmul %8, %9, %cst_8 {dimension_numbers = #tpu.dot_dimension_numbers<[1], [0], [0], [1], [0, 0, 1, 1], [], []>} : vector<16x256xbf16>, vector<256x256xbf16>, vector<16x256xf32> -> vector<16x256xf32>
    %c0_9 = arith.constant 0 : index
    %c0_10 = arith.constant 0 : index
    %11 = vector.load %arg5[%c0_9, %c0_10] : memref<1x256xf32, #tpu.memory_space<vmem>>, vector<1x256xf32>
    %12 = vector.broadcast %11 : vector<1x256xf32> to vector<16x256xf32>
    %13 = arith.addf %10, %12 : vector<16x256xf32>
    %cst_11 = arith.constant 0.000000e+00 : f32
    %14 = vector.broadcast %cst_11 : f32 to vector<16x256xf32>
    %15 = arith.maximumf %13, %14 : vector<16x256xf32>
    %16 = arith.truncf %15 : vector<16x256xf32> to vector<16x256xbf16>
    %c0_12 = arith.constant 0 : index
    %c0_13 = arith.constant 0 : index
    %17 = vector.load %arg6[%c0_12, %c0_13] : memref<256x128xbf16, #tpu.memory_space<vmem>>, vector<256x128xbf16>
    %cst_14 = arith.constant dense<0.000000e+00> : vector<16x128xf32>
    %18 = tpu.matmul %16, %17, %cst_14 {dimension_numbers = #tpu.dot_dimension_numbers<[1], [0], [0], [1], [0, 0, 1, 1], [], []>} : vector<16x256xbf16>, vector<256x128xbf16>, vector<16x128xf32> -> vector<16x128xf32>
    %c0_15 = arith.constant 0 : index
    %c0_16 = arith.constant 0 : index
    %19 = vector.load %arg7[%c0_15, %c0_16] : memref<1x128xf32, #tpu.memory_space<vmem>>, vector<1x128xf32>
    %20 = vector.broadcast %19 : vector<1x128xf32> to vector<16x128xf32>
    %21 = arith.addf %18, %20 : vector<16x128xf32>
    %22 = tpu.iota {dimensions = array<i32: 1>} : vector<16x128xi32>
    %c0_i32 = arith.constant 0 : i32
    %23 = vector.broadcast %c0_i32 : i32 to vector<16x128xi32>
    %24 = arith.cmpi eq, %22, %23 : vector<16x128xi32>
    %cst_17 = arith.constant 2.000000e+00 : f32
    %25 = vector.broadcast %cst_17 : f32 to vector<16x128xf32>
    %26 = arith.mulf %25, %21 : vector<16x128xf32>
    %27 = arith.select %24, %21, %26 : vector<16x128xi1>, vector<16x128xf32>
    %cst_18 = arith.constant 0.000000e+00 : f32
    %28 = vector.broadcast %cst_18 : f32 to vector<16x128xf32>
    %29 = arith.subf %28, %27 : vector<16x128xf32>
    %30 = math.exp %29 : vector<16x128xf32>
    %cst_19 = arith.constant 1.000000e+00 : f32
    %31 = vector.broadcast %cst_19 : f32 to vector<16x128xf32>
    %32 = arith.addf %31, %30 : vector<16x128xf32>
    %33 = tpu.reciprocal %32 {approx = true} : vector<16x128xf32> -> vector<16x128xf32>
    %c0_i32_20 = arith.constant 0 : i32
    %34 = vector.broadcast %c0_i32_20 : i32 to vector<16x128xi32>
    %35 = arith.cmpi eq, %22, %34 : vector<16x128xi32>
    %cst_21 = arith.constant 2.200000e-01 : f32
    %36 = vector.broadcast %cst_21 : f32 to vector<16x128xf32>
    %37 = arith.mulf %33, %36 : vector<16x128xf32>
    %c1_i32 = arith.constant 1 : i32
    %38 = vector.broadcast %c1_i32 : i32 to vector<16x128xi32>
    %39 = arith.cmpi eq, %22, %38 : vector<16x128xi32>
    %cst_22 = arith.constant 2.000000e+00 : f32
    %40 = vector.broadcast %cst_22 : f32 to vector<16x128xf32>
    %41 = arith.mulf %40, %33 : vector<16x128xf32>
    %cst_23 = arith.constant 1.000000e+00 : f32
    %42 = vector.broadcast %cst_23 : f32 to vector<16x128xf32>
    %43 = arith.subf %41, %42 : vector<16x128xf32>
    %cst_24 = arith.constant 2.000000e+00 : f32
    %44 = vector.broadcast %cst_24 : f32 to vector<16x128xf32>
    %45 = arith.mulf %43, %44 : vector<16x128xf32>
    %46 = arith.select %39, %45, %21 : vector<16x128xi1>, vector<16x128xf32>
    %47 = arith.select %35, %37, %46 : vector<16x128xi1>, vector<16x128xf32>
    %c0_25 = arith.constant 0 : index
    %c0_26 = arith.constant 0 : index
    %48 = vector.load %arg8[%c0_25, %c0_26] : memref<16x128xf32, #tpu.memory_space<vmem>>, vector<16x128xf32>
    tpu.vector_store %arg8[%c0_25, %c0_26], %47 {strides = array<i32>} : memref<16x128xf32, #tpu.memory_space<vmem>>, vector<16x128xf32>,
    return
  }
  func.func @transform_0(%arg0: i32) -> (i32, i32) {
    %c0_i32 = arith.constant 0 : i32
    %c0_i32_0 = arith.constant 0 : i32
    return %arg0, %c0_i32 : i32, i32
  }
  func.func @transform_1(%arg0: i32) -> (i32, i32) {
    %c0_i32 = arith.constant 0 : i32
    %c0_i32_0 = arith.constant 0 : i32
    %c0_i32_1 = arith.constant 0 : i32
    return %c0_i32, %c0_i32_0 : i32, i32
  }
  func.func @transform_2(%arg0: i32) -> (i32, i32) {
    %c0_i32 = arith.constant 0 : i32
    %c0_i32_0 = arith.constant 0 : i32
    %c0_i32_1 = arith.constant 0 : i32
    return %c0_i32, %c0_i32_0 : i32, i32
  }
  func.func @transform_3(%arg0: i32) -> (i32, i32) {
    %c0_i32 = arith.constant 0 : i32
    %c0_i32_0 = arith.constant 0 : i32
    %c0_i32_1 = arith.constant 0 : i32
    return %c0_i32, %c0_i32_0 : i32, i32
  }
  func.func @transform_4(%arg0: i32) -> (i32, i32) {
    %c0_i32 = arith.constant 0 : i32
    %c0_i32_0 = arith.constant 0 : i32
    %c0_i32_1 = arith.constant 0 : i32
    return %c0_i32, %c0_i32_0 : i32, i32
  }
  func.func @transform_5(%arg0: i32) -> (i32, i32) {
    %c0_i32 = arith.constant 0 : i32
    %c0_i32_0 = arith.constant 0 : i32
    %c0_i32_1 = arith.constant 0 : i32
    return %c0_i32, %c0_i32_0 : i32, i32
  }
  func.func @transform_6(%arg0: i32) -> (i32, i32) {
    %c0_i32 = arith.constant 0 : i32
    %c0_i32_0 = arith.constant 0 : i32
    %c0_i32_1 = arith.constant 0 : i32
    return %c0_i32, %c0_i32_0 : i32, i32
  }
  func.func @transform_7(%arg0: i32) -> (i32, i32) {
    %c0_i32 = arith.constant 0 : i32
    %c0_i32_0 = arith.constant 0 : i32
    return %arg0, %c0_i32 : i32, i32
  }
}

</mosaic_0001>

<bundles_post_ra>
// kernel: tpu_custom_call.1
= control target key start
LH: loop header
LB: loop body
LE: loop exit
PB: predicated region body
PF: predicated region fallthrough
CT: control target
= control target key end

     0   :  { %12 = vsyncpa [#allocation3], 0  ;;  %s1005_s0 = inlined_call_operand.hbm [shape: bf16[16,16], index: 0, kind: input, shape index: {}]   ;;  %s1006_s1 = inlined_call_operand.hbm [shape: bf16[16,256], index: 1, kind: input, shape index: {}]   ;;  %s1007_s2 = inlined_call_operand.vmem [shape: f32[1,256], index: 2, kind: input, shape index: {}]   ;;  %s1008_s3 = inlined_call_operand.hbm [shape: bf16[256,256], index: 3, kind: input, shape index: {}]   ;;  %s1009_s4 = inlined_call_operand.vmem [shape: f32[1,256], index: 4, kind: input, shape index: {}]   ;;  %s1010_s5 = inlined_call_operand.hbm [shape: bf16[256,128], index: 5, kind: input, shape index: {}]   ;;  %s1011_s6 = inlined_call_operand.vmem [shape: f32[1,128], index: 6, kind: input, shape index: {}]   ;;  %s1012_s7 = inlined_call_operand.hbm [shape: f32[16,128], index: 7, kind: output, shape index: {}]  }
   0x1   :  { %13 = vsyncpa [#allocation6], 0 }
   0x2   :  { %14 = vsyncpa [#allocation9], 0 }
   0x3   :  { %15 = vsyncpa [#allocation4], 0  ;;  %s918_s24 = smov [#allocation5]  }
   0x4   :  { %s33_s25 = sshll.u32 %s918_s24, 4  ;;  %s34_s25 = int_to_ptr.vmem [resolvable:$true] %s33_s25 }
   0x5   :  { %s818_s26 = scalar_lea.vmem %s34_s25, 256  ;;  %p823_p1 = scmp.lt.s32.totalorder %s34_s25, %s34_s25 }
   0x6   :  { %p819_p0 = scmp.ne.s32.totalorder %s34_s25, %s818_s26  ;;  %p824_p2 = scmp.lt.s32.totalorder %s818_s26, %s818_s26 }
   0x8   :  { %p825_p3 = por %p824_p2, %p823_p1 }
   0xa   :  { %p826_p4 = pnand %p825_p3, %p819_p0 }
   0xc   :  { %829 = shalt.err (!%p826_p4)
}
   0xd   :  { %s919_s27 = smov 128   ;;  %s920_s28 = smov 8  }
   0xe   :  { %39 = dma.hbm_to_vmem [thread:$0]  %s1006_s1, 256, %s34_s25, [#allocation6], %s919_s27, %s919_s27, %s920_s28  }
   0xf   :  { %s921_s8 = smov [#allocation2]  }
  0x10   :  { %s21_s9 = sshll.u32 %s921_s8, 4  ;;  %s22_s9 = int_to_ptr.vmem [resolvable:$true] %s21_s9 }
  0x11   :  { %s838_s10 = scalar_lea.vmem %s22_s9, 128  ;;  %p843_p6 = scmp.lt.s32.totalorder %s22_s9, %s22_s9 }
  0x12   :  { %p839_p5 = scmp.ne.s32.totalorder %s22_s9, %s838_s10  ;;  %p844_p7 = scmp.lt.s32.totalorder %s838_s10, %s838_s10 }
  0x14   :  { %p845_p8 = por %p844_p7, %p843_p6 }
  0x16   :  { %p846_p9 = pnand %p845_p8, %p839_p5 }
  0x18   :  { %849 = shalt.err (!%p846_p9)
}
  0x19   :  { %s922_s11 = smov 64   ;;  %s923_s12 = smov 4  }
  0x1a   :  { %27 = dma.hbm_to_vmem [thread:$0]  %s1005_s0, 128, %s22_s9, [#allocation3], %s922_s11, %s922_s11, %s923_s12  }
  0x1b   :  { %s924_s15 = smov [#allocation7]   ;;  %s925_s17 = smov [#allocation8]  }
  0x1c   :  { %s47_s16 = sshll.u32 %s924_s15, 4  ;;  %s61_s1 = sshll.u32 %s925_s17, 4  ;;  %s48_s16 = int_to_ptr.vmem [resolvable:$true] %s47_s16  ;;  %s62_s1 = int_to_ptr.vmem [resolvable:$true] %s61_s1 }
  0x1d   :  { %s858_s18 = scalar_lea.vmem %s48_s16, 4096  ;;  %p863_p11 = scmp.lt.s32.totalorder %s48_s16, %s48_s16 }
  0x1e   :  { %p859_p10 = scmp.ne.s32.totalorder %s48_s16, %s858_s18  ;;  %p864_p12 = scmp.lt.s32.totalorder %s858_s18, %s858_s18 }
  0x20   :  { %p865_p13 = por %p864_p12, %p863_p11 }
  0x22   :  { %p866_p0 = pnand %p865_p13, %p859_p10 }
  0x24   :  { %869 = shalt.err (!%p866_p0)
}
  0x25   :  { %53 = dma.hbm_to_vmem [thread:$0]  %s1008_s3, 4096, %s48_s16, [#allocation6], %s919_s27, %s919_s27, %s920_s28  }
  0x26   :  { %s878_s0 = scalar_lea.vmem %s62_s1, 2048  ;;  %p883_p2 = scmp.lt.s32.totalorder %s62_s1, %s62_s1 }
  0x27   :  { %p879_p1 = scmp.ne.s32.totalorder %s62_s1, %s878_s0  ;;  %p884_p3 = scmp.lt.s32.totalorder %s878_s0, %s878_s0 }
  0x29   :  { %p885_p4 = por %p884_p3, %p883_p2 }
  0x2b   :  { %p886_p5 = pnand %p885_p4, %p879_p1 }
  0x2d   :  { %889 = shalt.err (!%p886_p5)
}
  0x2e   :  { %67 = dma.hbm_to_vmem [thread:$0]  %s1010_s5, 2048, %s62_s1, [#allocation9], %s922_s11, %s922_s11, %s923_s12  }
  0x2f   :  { %910 = dma.done.wait [#allocation3], 128  }
  0x30   :  { %911 = vsyncadd [#allocation3], 4294967168 }
  0x31   :  { %912 = dma.done.wait [#allocation6], 4352  }
  0x32   :  { %913 = vsyncadd [#allocation6], 4294962944 }
  0x33   :  { %914 = dma.done.wait [#allocation9], 2048  }
  0x34   :  { %915 = vsyncadd [#allocation9], 4294965248  ;;  %v926_v0 = vmov 0   ;;  %v734_v1 = vld [vmem:[#allocation5 + $0x4] ss:$8 sps:$4 sm:$0xff]   ;;  %v737_v3 = vld [vmem:[#allocation2] sm:$0xff]   ;;  %v89_v46 = vlaneseq }
  0x35   :  { %150 = vmatprep.mubr.bf16.mxu0 %v926_v0  ;;  %v736_v2 = vld [vmem:[#allocation5] ss:$8 sps:$4 sm:$0xff]   ;;  %132 = vmatprep.subr.bf16.mxu0 %v734_v1  ;;  %vm114_vm0 = vcmask 130048   ;;  %v738_v4 = vld [vmem:[#allocation7 + $0x74] ss:$8 sps:$4 sm:$0xff]   ;;  %v790_v40 = vld [vmem:[#allocation8 + $0x68] sm:$0xff]  }
  0x36   :  { %133 = vmatpush1.bf16.msra.mxu0 %v736_v2  ;;  %v740_v5 = vld [vmem:[#allocation7 + $0x70] ss:$8 sps:$4 sm:$0xff]   ;;  %v741_v6 = vld [vmem:[#allocation7 + $0x64] ss:$8 sps:$4 sm:$0xff]   ;;  %371 = vmatprep.subr.bf16.mxu1 %v738_v4  ;;  %v743_v7 = vld [vmem:[#allocation7 + $0x60] ss:$8 sps:$4 sm:$0xff]  }
  0x37   :  { %372 = vmatpush1.bf16.msra.mxu1 %v740_v5  ;;  %v744_v8 = vld [vmem:[#allocation7 + $0x54] ss:$8 sps:$4 sm:$0xff]   ;;  %v746_v9 = vld [vmem:[#allocation7 + $0x50] ss:$8 sps:$4 sm:$0xff]   ;;  %v747_v10 = vld [vmem:[#allocation7 + $0x44] ss:$8 sps:$4 sm:$0xff]  }
  0x38   :  { %373 = vmatprep.subr.bf16.mxu1 %v741_v6  ;;  %v749_v11 = vld [vmem:[#allocation7 + $0x40] ss:$8 sps:$4 sm:$0xff]   ;;  %v750_v12 = vld [vmem:[#allocation7 + $0x34] ss:$8 sps:$4 sm:$0xff]   ;;  %v752_v13 = vld [vmem:[#allocation7 + $0x30] ss:$8 sps:$4 sm:$0xff]  }
  0x39   :  { %650 = vmatmul.mubr.msk.bf16.vlgmr.msra.gmra.mxu0 %vm114_vm0, %v737_v3  ;;  %v753_v14 = vld [vmem:[#allocation7 + $0x24] ss:$8 sps:$4 sm:$0xff]   ;;  %v755_v15 = vld [vmem:[#allocation7 + $0x20] ss:$8 sps:$4 sm:$0xff]   ;;  %v756_v16 = vld [vmem:[#allocation7 + $0x14] ss:$8 sps:$4 sm:$0xff]  }
  0x3a   :  { %v758_v17 = vld [vmem:[#allocation7 + $0x10] ss:$8 sps:$4 sm:$0xff]   ;;  %v759_v18 = vld [vmem:[#allocation7 + $0x4] ss:$8 sps:$4 sm:$0xff]   ;;  %v761_v19 = vld [vmem:[#allocation7] ss:$8 sps:$4 sm:$0xff]  }
  0x3b   :  { %374 = vmatpush1.bf16.msra.mxu1 %v743_v7  ;;  %v762_v20 = vld [vmem:[#allocation7 + $0xf4] ss:$8 sps:$4 sm:$0xff]   ;;  %v764_v21 = vld [vmem:[#allocation7 + $0xf0] ss:$8 sps:$4 sm:$0xff]   ;;  %v765_v22 = vld [vmem:[#allocation7 + $0xe4] ss:$8 sps:$4 sm:$0xff]  }
  0x3c   :  { %375 = vmatprep.subr.bf16.mxu1 %v744_v8  ;;  %v767_v23 = vld [vmem:[#allocation7 + $0xe0] ss:$8 sps:$4 sm:$0xff]   ;;  %v768_v24 = vld [vmem:[#allocation7 + $0xd4] ss:$8 sps:$4 sm:$0xff]   ;;  %v770_v25 = vld [vmem:[#allocation7 + $0xd0] ss:$8 sps:$4 sm:$0xff]  }
  0x3d   :  { %v771_v26 = vld [vmem:[#allocation7 + $0xc4] ss:$8 sps:$4 sm:$0xff]   ;;  %v773_v27 = vld [vmem:[#allocation7 + $0xc0] ss:$8 sps:$4 sm:$0xff]   ;;  %v774_v28 = vld [vmem:[#allocation7 + $0xb4] ss:$8 sps:$4 sm:$0xff]  }
  0x3e   :  { %v776_v29 = vld [vmem:[#allocation7 + $0xb0] ss:$8 sps:$4 sm:$0xff]   ;;  %v777_v30 = vld [vmem:[#allocation7 + $0xa4] ss:$8 sps:$4 sm:$0xff]   ;;  %v779_v31 = vld [vmem:[#allocation7 + $0xa0] ss:$8 sps:$4 sm:$0xff]  }
  0x3f   :  { %376 = vmatpush1.bf16.msra.mxu1 %v746_v9  ;;  %v780_v32 = vld [vmem:[#allocation7 + $0x94] ss:$8 sps:$4 sm:$0xff]   ;;  %v782_v33 = vld [vmem:[#allocation7 + $0x90] ss:$8 sps:$4 sm:$0xff]   ;;  %v783_v34 = vld [vmem:[#allocation7 + $0x84] ss:$8 sps:$4 sm:$0xff]  }
  0x40   :  { %377 = vmatprep.subr.bf16.mxu1 %v747_v10  ;;  %v785_v35 = vld [vmem:[#allocation7 + $0x80] ss:$8 sps:$4 sm:$0xff]   ;;  %v786_v36 = vld [vmem:[#allocation8 + $0x78] sm:$0xff]   ;;  %v788_v38 = vld [vmem:[#allocation8 + $0x70] sm:$0xff]   ;;  %v90_v47 = vshrl.u32 %v89_v46, 7 }
  0x41   :  { %v787_v37 = vld [vmem:[#allocation8 + $0x38] sm:$0xff]   ;;  %702 = vmatprep.subr.bf16.mxu0 %v786_v36  ;;  %v789_v39 = vld [vmem:[#allocation8 + $0x30] sm:$0xff]   ;;  %v791_v41 = vld [vmem:[#allocation8 + $0x28] sm:$0xff]  }
  0x42   :  { %703 = vmatpush3.bf16.msra.mxu0 %v787_v37  ;;  %v792_v42 = vld [vmem:[#allocation8 + $0x60] sm:$0xff]   ;;  %v794_v44 = vld [vmem:[#allocation8 + $0x58] sm:$0xff]   ;;  %v95_v48 = vsub.s32 1, %v90_v47  ;;  %v91_v49 = vsub.s32 0, %v90_v47  ;;  %v87_v50 = vld [vmem:[%s1007_s2] sm:$0x3] }
  0x43   :  { %378 = vmatpush1.bf16.msra.mxu1 %v749_v11  ;;  %704 = vmatprep.subr.bf16.mxu0 %v788_v38  ;;  %v793_v43 = vld [vmem:[#allocation8 + $0x20] sm:$0xff]   ;;  %v795_v45 = vld [vmem:[#allocation8 + $0x18] sm:$0xff]   ;;  %v796_v3 = vld [vmem:[#allocation8 + $0x50] sm:$0xff]  }
  0x44   :  { %379 = vmatprep.subr.bf16.mxu1 %v750_v12  ;;  %v96_v52 = vrot.slane %v87_v50, %v95_v48  ;;  %v92_v53 = vrot.slane %v87_v50, %v91_v49  ;;  %v797_v4 = vld [vmem:[#allocation8 + $0x10] sm:$0xff]   ;;  %v798_v5 = vld [vmem:[#allocation8 + $0x48] sm:$0xff]   ;;  %v800_v7 = vld [vmem:[#allocation8 + $0x40] sm:$0xff]  }
  0x45   :  { %v799_v6 = vld [vmem:[#allocation8 + $0x8] sm:$0xff]   ;;  %v801_v8 = vld [vmem:[#allocation8] sm:$0xff]  }
  0x46   :  { %705 = vmatpush3.bf16.msra.mxu0 %v789_v39  ;;  %v199_v9 = vld [vmem:[%s1009_s4] sm:$0x3] }
  0x47   :  { %380 = vmatpush1.bf16.msra.mxu1 %v752_v13  ;;  %706 = vmatprep.subr.bf16.mxu0 %v790_v40  ;;  %v208_v11 = vrot.slane %v199_v9, %v95_v48  ;;  %v204_v12 = vrot.slane %v199_v9, %v91_v49 }
  0x48   :  { %381 = vmatprep.subr.bf16.mxu1 %v753_v14 }
  0x4a   :  { %707 = vmatpush3.bf16.msra.mxu0 %v791_v41 }
  0x4b   :  { %382 = vmatpush1.bf16.msra.mxu1 %v755_v15  ;;  %708 = vmatprep.subr.bf16.mxu0 %v792_v42 }
  0x4c   :  { %383 = vmatprep.subr.bf16.mxu1 %v756_v16 }
  0x4e   :  { %709 = vmatpush3.bf16.msra.mxu0 %v793_v43 }
  0x4f   :  { %384 = vmatpush1.bf16.msra.mxu1 %v758_v17  ;;  %710 = vmatprep.subr.bf16.mxu0 %v794_v44 }
  0x50   :  { %385 = vmatprep.subr.bf16.mxu1 %v759_v18 }
  0x52   :  { %711 = vmatpush3.bf16.msra.mxu0 %v795_v45 }
  0x53   :  { %386 = vmatpush1.bf16.msra.mxu1 %v761_v19  ;;  %712 = vmatprep.subr.bf16.mxu0 %v796_v3 }
  0x54   :  { %387 = vmatprep.subr.bf16.mxu1 %v762_v20 }
  0x56   :  { %713 = vmatpush3.bf16.msra.mxu0 %v797_v4 }
  0x57   :  { %388 = vmatpush2.bf16.msra.mxu1 %v764_v21  ;;  %714 = vmatprep.subr.bf16.mxu0 %v798_v5 }
  0x58   :  { %389 = vmatprep.subr.bf16.mxu1 %v765_v22 }
  0x5a   :  { %715 = vmatpush3.bf16.msra.mxu0 %v799_v6 }
  0x5b   :  { %390 = vmatpush2.bf16.msra.mxu1 %v767_v23  ;;  %716 = vmatprep.subr.bf16.mxu0 %v800_v7 }
  0x5c   :  { %391 = vmatprep.subr.bf16.mxu1 %v768_v24 }
  0x5e   :  { %717 = vmatpush3.bf16.msra.mxu0 %v801_v8 }
  0x5f   :  { %392 = vmatpush2.bf16.msra.mxu1 %v770_v25 }
  0x60   :  { %393 = vmatprep.subr.bf16.mxu1 %v771_v26 }
  0x63   :  { %394 = vmatpush2.bf16.msra.mxu1 %v773_v27  ;;  %v597_v27 = vand.u32 127, %v89_v46 }
  0x64   :  { %395 = vmatprep.subr.bf16.mxu1 %v774_v28  ;;  %v683_v28 = vld [vmem:[%s1011_s6] ss:$0 sm:$0xff]  ;;  %s927_s6 = smov [#allocation10]  }
  0x65   :  { %vm598_vm1 = vcmp.eq.s32.totalorder %v597_v27, 0  ;;  %vm615_vm2 = vcmp.eq.s32.totalorder %v597_v27, 1  ;;  %s633_s25 = sshll.u32 %s927_s6, 4  ;;  %s634_s25 = int_to_ptr.vmem [resolvable:$true] %s633_s25 }
  0x66   :  { %s890_s26 = scalar_lea.vmem %s634_s25, 256  ;;  %p895_p7 = scmp.lt.s32.totalorder %s634_s25, %s634_s25 }
  0x67   :  { %396 = vmatpush2.bf16.msra.mxu1 %v776_v29  ;;  %p891_p6 = scmp.ne.s32.totalorder %s634_s25, %s890_s26  ;;  %p896_p8 = scmp.lt.s32.totalorder %s890_s26, %s890_s26 }
  0x68   :  { %397 = vmatprep.subr.bf16.mxu1 %v777_v30 }
  0x69   :  { %p897_p9 = por %p896_p8, %p895_p7 }
  0x6b   :  { %398 = vmatpush2.bf16.msra.mxu1 %v779_v31  ;;  %p898_p10 = pnand %p897_p9, %p891_p6 }
  0x6c   :  { %399 = vmatprep.subr.bf16.mxu1 %v780_v32 }
  0x6f   :  { %400 = vmatpush2.bf16.msra.mxu1 %v782_v33 }
  0x70   :  { %401 = vmatprep.subr.bf16.mxu1 %v783_v34 }
  0x73   :  { %402 = vmatpush2.bf16.msra.mxu1 %v785_v35 }
  0xf9   :  { %v152_v51 = vpop.f32.mrf.mxu0 }
  0xfa   :  { %v153_v58 = vadd.f32 %v152_v51, %v92_v53 }
  0xfb   :  { %v154_v54 = vpop.f32.mrf.mxu0 }
  0xfc   :  { %v155_v56 = vadd.f32 %v154_v54, %v96_v52  ;;  %v161_v0 = vmax.f32 %v153_v58, 0.0 }
  0xfd   :  { %v156_v55 = vpop.f32.mrf.mxu0 }
  0xfe   :  { %v157_v57 = vadd.f32 %v156_v55, %v92_v53  ;;  %v162_v62 = vmax.f32 %v155_v56, 0.0 }
  0xff   :  { %v158_v59 = vpop.f32.mrf.mxu0 }
 0x100   :  { %v159_v60 = vadd.f32 %v158_v59, %v96_v52  ;;  %v163_v61 = vmax.f32 %v157_v57, 0.0 }
 0x102   :  { %v164_v63 = vmax.f32 %v159_v60, 0.0  ;;  %v165_v2 = vpack.c.bf16 %v163_v61, %v161_v0 }
 0x104   :  { %v166_v1 = vpack.c.bf16 %v164_v63, %v162_v62 }
 0x106   :  { %403 = vmatprep.mubr.bf16.mxu1 %v166_v1 }
 0x107   :  { %404 = vmatmul.mubr.bf16.vlgmr.msra.gmra.mxu1 %v165_v2 }
 0x1c7   :  { %v405_v10 = vpop.f32.mrf.mxu1 }
 0x1c8   :  { %v406_v17 = vadd.f32 %v405_v10, %v204_v12 }
 0x1c9   :  { %v407_v13 = vpop.f32.mrf.mxu1 }
 0x1ca   :  { %v408_v15 = vadd.f32 %v407_v13, %v208_v11  ;;  %v414_v23 = vmax.f32 %v406_v17, 0.0 }
 0x1cb   :  { %v409_v14 = vpop.f32.mrf.mxu1 }
 0x1cc   :  { %v410_v16 = vadd.f32 %v409_v14, %v204_v12  ;;  %v415_v21 = vmax.f32 %v408_v15, 0.0 }
 0x1cd   :  { %v411_v18 = vpop.f32.mrf.mxu1 }
 0x1ce   :  { %v412_v19 = vadd.f32 %v411_v18, %v208_v11  ;;  %v416_v20 = vmax.f32 %v410_v16, 0.0 }
 0x1d0   :  { %v417_v22 = vmax.f32 %v412_v19, 0.0  ;;  %v418_v25 = vpack.c.bf16 %v416_v20, %v414_v23 }
 0x1d2   :  { %v419_v24 = vpack.c.bf16 %v417_v22, %v415_v21 }
 0x1d4   :  { %587 = vmatprep.mubr.bf16.mxu0 %v419_v24 }
 0x1d5   :  { %588 = vmatmul.mubr.bf16.vlgmr.msra.gmra.mxu0 %v418_v25 }
 0x295   :  { %v718_v26 = vpop.f32.mrf.mxu0 }
 0x297   :  { %v719_v29 = vpop.f32.mrf.mxu0 }
 0x298   :  { %v720_v30 = vadd.f32 %v719_v29, %v718_v26 }
 0x299   :  { %v721_v31 = vpop.f32.mrf.mxu0 }
 0x29a   :  { %v590_v32 = vadd.f32 %v720_v30, %v683_v28 }
 0x29b   :  { %v722_v33 = vpop.f32.mrf.mxu0 }
 0x29c   :  { %v599_v34 = vmul.f32 2.0, %v590_v32  ;;  %v723_v35 = vadd.f32 %v722_v33, %v721_v31 }
 0x29e   :  { %v601_v36 = vsel %vm598_vm1, %v590_v32, %v599_v34  ;;  %v593_v37 = vadd.f32 %v723_v35, %v683_v28 }
 0x29f   :  { %v603_v38 = vsub.f32 0.0, %v601_v36 }
 0x2a0   :  { %v600_v39 = vmul.f32 2.0, %v593_v37 }
 0x2a1   :  { %v605_v40 = vmul.f32 1.442695, %v603_v38 }
 0x2a2   :  { %v602_v41 = vsel %vm598_vm1, %v593_v37, %v600_v39 }
 0x2a3   :  { %802 = vpow2.f32 %v605_v40  ;;  %v604_v42 = vsub.f32 0.0, %v602_v41 }
 0x2a5   :  { %v607_v43 = vmul.f32 1.442695, %v604_v42 }
 0x2a7   :  { %804 = vpow2.f32 %v607_v43 }
 0x2b0   :  { %v803_v44 = vpop.eup %802 }
 0x2b1   :  { %v609_v45 = vadd.f32 1.0, %v803_v44 }
 0x2b3   :  { %806 = vrcp.f32 %v609_v45 }
 0x2b4   :  { %v805_v46 = vpop.eup %804 }
 0x2b5   :  { %v610_v47 = vadd.f32 1.0, %v805_v46 }
 0x2b7   :  { %808 = vrcp.f32 %v610_v47 }
 0x2c0   :  { %v807_v48 = vpop.eup %806 }
 0x2c1   :  { %v616_v49 = vmul.f32 2.0, %v807_v48  ;;  %v613_v54 = vmul.f32 0.22, %v807_v48 }
 0x2c3   :  { %v700_v50 = vadd.f32 -1.0, %v616_v49 }
 0x2c4   :  { %v809_v51 = vpop.eup %808 }
 0x2c5   :  { %v617_v52 = vmul.f32 2.0, %v809_v51  ;;  %v620_v53 = vmul.f32 2.0, %v700_v50  ;;  %v614_v59 = vmul.f32 0.22, %v809_v51 }
 0x2c7   :  { %v701_v55 = vadd.f32 -1.0, %v617_v52  ;;  %v622_v56 = vsel %vm615_vm2, %v620_v53, %v590_v32 }
 0x2c8   :  { %v624_v57 = vsel %vm598_vm1, %v613_v54, %v622_v56 }
 0x2c9   :  { %v621_v58 = vmul.f32 2.0, %v701_v55  ;;  %626 = vst [vmem:[#allocation10] sm:$0xff] %v624_v57 }
 0x2cb   :  { %v623_v60 = vsel %vm615_vm2, %v621_v58, %v593_v37 }
 0x2cc   :  { %v625_v61 = vsel %vm598_vm1, %v614_v59, %v623_v60 }
 0x2cd   :  { %627 = vst [vmem:[#allocation10 + $0x8] sm:$0xff] %v625_v61 }
 0x2ce   :  { %901 = shalt.err (!%p898_p10)
}
 0x2cf   :  { %639 = dma.vmem_to_hbm [thread:$0]  %s634_s25, 256, %s1012_s7, [#allocation4], %s919_s27, %s919_s27, %s920_s28  }
 0x2d0   :  { %916 = dma.done.wait [#allocation4], 256  }
 0x2d1   :  { %917 = vsyncadd [#allocation4], 4294967040 }
 0x2d2   :  { %643 = vsyncpa [#allocation3], 1 }
 0x2d3   :  { %644 = vsyncpa [#allocation6], 1 }
 0x2d4   :  { %645 = vsyncpa [#allocation9], 1 }
 0x2d5   :  { %646 = vsyncpa [#allocation4], 1 }

</bundles_post_ra>
